<compile_context>
chip_gen: v5e
topology: v5e:2x2
jax: 0.10.0
libtpu: 0.0.40
codegen_flags: <defaults>
</compile_context>

<pallas_src>
import jax
import jax.numpy as jnp
import numpy as np
from jax import lax
from jax.experimental import pallas as pl
from jax.experimental.pallas import tpu as pltpu

HIDDEN = 128  # fixed by the module (nn.Linear(128, 128))


def _pick_chunk(total_t, max_chunk=16):
    """Largest divisor of total_t that is <= max_chunk (keeps unrolling modest)."""
    for c in range(min(max_chunk, total_t), 0, -1):
        if total_t % c == 0:
            return c
    return 1


def _pick_bs_block(bs, max_block=256):
    """Batch block size: full batch if small, else a divisor (multiple of 8) <= max_block."""
    if bs <= max_block:
        return bs
    for b in range(max_block, 7, -8):
        if bs % b == 0:
            return b
    return bs


def _make_stc_lif_call(total_t, t_chunk, bs, bs_block, thresh, use_beta, gate_width):
    """pallas_call running the total_t-step LIF recurrence on (total_t, bs, 128) input."""
    n_chunks = total_t // t_chunk
    n_bblocks = bs // bs_block

    def kernel(x_ref, mem0_ref, spike0_ref, w_ref, b_ref,
               out_ref, memf_ref, spikef_ref, mem_sc, spike_sc):
        c = pl.program_id(1)  # time-chunk index (sequential)

        # (Re-)initialize the carry at the start of each batch block's time sweep.
        @pl.when(c == 0)
        def _():
            mem_sc[...] = mem0_ref[...]
            spike_sc[...] = spike0_ref[...]

        # Hoist weight/bias loads out of the inner time loop.
        w = w_ref[...]          # (HIDDEN, gate_width) bf16
        bias = b_ref[...]       # (1, gate_width) f32

        def step(i, carry):
            mem, spike = carry
            # Fused gate matmul on the MXU (bf16 operands, f32 accumulation) + EUP tanh.
            gates = jnp.tanh(
                jnp.dot(spike.astype(jnp.bfloat16), w,
                        preferred_element_type=jnp.float32) + bias)
            xt = x_ref[i]  # (bs_block, HIDDEN)
            if use_beta:
                gamma = 0.5 * (1.0 + gates[:, :HIDDEN])
                beta = 0.5 * (1.0 + gates[:, HIDDEN:])
                mem = mem * beta + xt * gamma
            else:
                gamma = 0.5 * (1.0 + gates)
                mem = mem + xt * gamma
            # ZIF surrogate spike (forward = Heaviside), scaled by thresh.
            spike = (mem - thresh >= 0.0).astype(jnp.float32) * thresh
            mem = mem * (1.0 - spike)
            out_ref[i] = spike
            return mem, spike

        mem, spike = lax.fori_loop(0, t_chunk, step,
                                   (mem_sc[...], spike_sc[...]), unroll=True)
        mem_sc[...] = mem
        spike_sc[...] = spike

        @pl.when(c == pl.num_programs(1) - 1)
        def _():
            memf_ref[...] = mem
            spikef_ref[...] = spike

    grid_spec = pltpu.PrefetchScalarGridSpec(
        num_scalar_prefetch=0,
        grid=(n_bblocks, n_chunks),
        in_specs=[
            pl.BlockSpec((t_chunk, bs_block, HIDDEN), lambda b, c: (c, b, 0)),  # x
            pl.BlockSpec((bs_block, HIDDEN), lambda b, c: (b, 0)),              # mem0
            pl.BlockSpec((bs_block, HIDDEN), lambda b, c: (b, 0)),              # spike0
            pl.BlockSpec((HIDDEN, gate_width), lambda b, c: (0, 0)),            # fused W^T (bf16)
            pl.BlockSpec((1, gate_width), lambda b, c: (0, 0)),                 # fused bias (f32)
        ],
        out_specs=[
            pl.BlockSpec((t_chunk, bs_block, HIDDEN), lambda b, c: (c, b, 0)),  # spikes per t
            pl.BlockSpec((bs_block, HIDDEN), lambda b, c: (b, 0)),              # final mem
            pl.BlockSpec((bs_block, HIDDEN), lambda b, c: (b, 0)),              # final spike
        ],
        scratch_shapes=[
            pltpu.VMEM((bs_block, HIDDEN), jnp.float32),  # mem carry
            pltpu.VMEM((bs_block, HIDDEN), jnp.float32),  # spike carry
        ],
    )

    return pl.pallas_call(
        kernel,
        out_shape=(
            jax.ShapeDtypeStruct((total_t, bs, HIDDEN), jnp.float32),
            jax.ShapeDtypeStruct((bs, HIDDEN), jnp.float32),
            jax.ShapeDtypeStruct((bs, HIDDEN), jnp.float32),
        ),
        grid_spec=grid_spec,
        compiler_params=pltpu.CompilerParams(
            # batch blocks are independent (v7x dual-TC); time recurrence is sequential
            dimension_semantics=("parallel", "arbitrary")),
    )


def stc_lif_forward(x, params, *, T, thresh=1.0, tau=1.0, gama=1.0,
                    mem=None, spike=None, max_chunk=16):
    """JAX/Pallas equivalent of STC_LIF.forward. Returns (output, final_mem, final_spike)."""
    # TODO(synk): tau / gama only affect the ZIF backward pass; forward-only kernel ignores them.
    w_gt, b_gt, w_gs, b_gs = params
    x = jnp.asarray(x, jnp.float32)

    if x.ndim == 3:
        steps, TB, H = x.shape
        use_beta = False
        gate_width = HIDDEN
        # 3-D branch never uses beta -> only W_gs / b_gs are shipped to the kernel.
        w_fused = w_gs.T.astype(jnp.bfloat16)
        b_fused = b_gs.reshape(1, HIDDEN).astype(jnp.float32)
    else:
        steps = None
        TB, H = x.shape
        use_beta = True
        gate_width = 2 * HIDDEN
        # Fuse the two gate projections into one (128, 256) matmul: [gamma | beta].
        w_fused = jnp.concatenate([w_gs.T, w_gt.T], axis=1).astype(jnp.bfloat16)
        b_fused = jnp.concatenate([b_gs, b_gt]).reshape(1, 2 * HIDDEN).astype(jnp.float32)

    assert H == HIDDEN, f"hidden dim must be {HIDDEN}"
    assert TB % T == 0, "leading (time*batch) dimension must be divisible by T"
    BS = TB // T

    if mem is None or spike is None:
        mem = jnp.zeros((BS, HIDDEN), jnp.float32)
        spike = jnp.zeros((BS, HIDDEN), jnp.float32)
    mem = jnp.asarray(mem, jnp.float32)
    spike = jnp.asarray(spike, jnp.float32)

    total_t = T if steps is None else steps * T
    t_chunk = _pick_chunk(total_t, max_chunk)
    bs_block = _pick_bs_block(BS)

    call = _make_stc_lif_call(total_t, t_chunk, BS, bs_block, float(thresh),
                              use_beta, gate_width)

    # ExpandTemporalDim across the (folded) outer step loop: (steps*T, BS, H).
    x_seq = x.reshape(total_t, BS, HIDDEN)
    out, mem, spike = call(x_seq, mem, spike, w_fused, b_fused)

    if steps is None:
        return out.reshape(T * BS, HIDDEN), mem, spike           # MergeTemporalDim
    return out.reshape(steps, T * BS, HIDDEN), mem, spike         # per-step MergeTemporalDim


# ------------------------- pure-JAX reference (for verification) -------------------------
def _reference_forward(x, params, *, T, thresh=1.0):
    """Faithful port of the PyTorch forward, using the same bf16 matmul casts as the kernel."""
    w_gt, b_gt, w_gs, b_gs = params
    wgt_bf = w_gt.T.astype(jnp.bfloat16)
    wgs_bf = w_gs.T.astype(jnp.bfloat16)

    def gate(spike, w_bf, b):
        return 0.5 * (1.0 + jnp.tanh(
            jnp.dot(spike.astype(jnp.bfloat16), w_bf,
                    preferred_element_type=jnp.float32) + b))

    def inner(x_exp, mem, spike, use_beta):
        outs = []
        for t in range(T):
            gamma = gate(spike, wgs_bf, b_gs)
            if use_beta:
                beta = gate(spike, wgt_bf, b_gt)
                mem = mem * beta + x_exp[t] * gamma
            else:
                mem = mem + x_exp[t] * gamma
            temp_spike = (mem - thresh >= 0).astype(jnp.float32)
            spike = temp_spike * thresh
            mem = mem * (1.0 - spike)
            outs.append(spike)
        return jnp.stack(outs, 0), mem, spike

    if x.ndim == 3:
        steps = x.shape[0]
        BS = x.shape[1] // T
        mem = jnp.zeros((BS, HIDDEN), jnp.float32)
        spike = jnp.zeros((BS, HIDDEN), jnp.float32)
        ep = []
        for s in range(steps):
            out, mem, spike = inner(x[s].reshape(T, BS, HIDDEN), mem, spike, use_beta=False)
            ep.append(out.reshape(T * BS, HIDDEN))
        return jnp.stack(ep, 0), mem, spike
    else:
        BS = x.shape[0] // T
        mem = jnp.zeros((BS, HIDDEN), jnp.float32)
        spike = jnp.zeros((BS, HIDDEN), jnp.float32)
        out, mem, spike = inner(x.reshape(T, BS, HIDDEN), mem, spike, use_beta=True)
        return out.reshape(T * BS, HIDDEN), mem, spike


if __name__ == "__main__":
    T = 4
    BS = 8
    STEPS = 2
    thresh = 1.0

    key = jax.random.PRNGKey(0)
    k1, k2, k3, k4, k5, k6 = jax.random.split(key, 6)

    # nn.Linear(128, 128)-style deterministic init: U(-1/sqrt(128), 1/sqrt(128))
    bound = 1.0 / np.sqrt(HIDDEN)
    w_gt = jax.random.uniform(k1, (HIDDEN, HIDDEN), jnp.float32, -bound, bound)
    b_gt = jax.random.uniform(k2, (HIDDEN,), jnp.float32, -bound, bound)
    w_gs = jax.random.uniform(k3, (HIDDEN, HIDDEN), jnp.float32, -bound, bound)
    b_gs = jax.random.uniform(k4, (HIDDEN,), jnp.float32, -bound, bound)
    params = (w_gt, b_gt, w_gs, b_gs)

    # 2-D branch input: (T*BS, 128); 3-D branch input: (steps, T*BS, 128)
    x2d = jax.random.normal(k5, (T * BS, HIDDEN), jnp.float32) * 2.0
    x3d = jax.random.normal(k6, (STEPS, T * BS, HIDDEN), jnp.float32) * 2.0

    y2d, mem2d, spk2d = stc_lif_forward(x2d, params, T=T, thresh=thresh)
    y3d, mem3d, spk3d = stc_lif_forward(x3d, params, T=T, thresh=thresh)
    jax.block_until_ready((y2d, mem2d, spk2d, y3d, mem3d, spk3d))

    # verify against a pure-JAX port of the PyTorch semantics
    r2d, rm2d, rs2d = _reference_forward(x2d, params, T=T, thresh=thresh)
    r3d, rm3d, rs3d = _reference_forward(x3d, params, T=T, thresh=thresh)
    np.testing.assert_allclose(np.asarray(y2d), np.asarray(r2d), rtol=1e-4, atol=1e-4)
    np.testing.assert_allclose(np.asarray(mem2d), np.asarray(rm2d), rtol=1e-4, atol=1e-4)
    np.testing.assert_allclose(np.asarray(spk2d), np.asarray(rs2d), rtol=1e-4, atol=1e-4)
    np.testing.assert_allclose(np.asarray(y3d), np.asarray(r3d), rtol=1e-4, atol=1e-4)
    np.testing.assert_allclose(np.asarray(mem3d), np.asarray(rm3d), rtol=1e-4, atol=1e-4)
    np.testing.assert_allclose(np.asarray(spk3d), np.asarray(rs3d), rtol=1e-4, atol=1e-4)

    print("KERNEL_OK")
</pallas_src>

<mosaic_0001>
module attributes {stable_mosaic.version = 11 : i64} {
  func.func @kernel(%arg0: i32, %arg1: i32, %arg2: memref<4x8x128xf32, #tpu.memory_space<vmem>>, %arg3: memref<8x128xf32, #tpu.memory_space<vmem>>, %arg4: memref<8x128xf32, #tpu.memory_space<vmem>>, %arg5: memref<128x256xbf16, #tpu.memory_space<vmem>>, %arg6: memref<1x256xf32, #tpu.memory_space<vmem>>, %arg7: memref<4x8x128xf32, #tpu.memory_space<vmem>>, %arg8: memref<8x128xf32, #tpu.memory_space<vmem>>, %arg9: memref<8x128xf32, #tpu.memory_space<vmem>>, %arg10: memref<8x128xf32, #tpu.memory_space<vmem>>, %arg11: memref<8x128xf32, #tpu.memory_space<vmem>>) attributes {dimension_semantics = [#tpu.dimension_semantics<parallel>, #tpu.dimension_semantics<arbitrary>], iteration_bounds = array<i64: 1, 1>, scalar_prefetch = 0 : i64, scratch_operands = 2 : i64, tpu.core_type = #tpu.core_type<tc>, window_params = [{transform_indices = @transform_0, window_bounds = array<i64: 4, 8, 128>}, {transform_indices = @transform_1, window_bounds = array<i64: 8, 128>}, {transform_indices = @transform_2, window_bounds = array<i64: 8, 128>}, {pipeline_mode = #tpu.pipeline_mode<synchronous>, transform_indices = @transform_3, window_bounds = array<i64: 128, 256>}, {pipeline_mode = #tpu.pipeline_mode<synchronous>, transform_indices = @transform_4, window_bounds = array<i64: 1, 256>}, {transform_indices = @transform_5, window_bounds = array<i64: 4, 8, 128>}, {transform_indices = @transform_6, window_bounds = array<i64: 8, 128>}, {transform_indices = @transform_7, window_bounds = array<i64: 8, 128>}]} {
    %c0_i32 = arith.constant 0 : i32
    %0 = arith.cmpi eq, %arg1, %c0_i32 : i32
    %1 = arith.extui %0 : i1 to i32
    %c0_i32_0 = arith.constant 0 : i32
    %2 = arith.cmpi ne, %1, %c0_i32_0 : i32
    scf.if %2 {
      %c0_66 = arith.constant 0 : index
      %c0_67 = arith.constant 0 : index
      %156 = vector.load %arg3[%c0_66, %c0_67] : memref<8x128xf32, #tpu.memory_space<vmem>>, vector<8x128xf32>
      %c0_68 = arith.constant 0 : index
      %c0_69 = arith.constant 0 : index
      %157 = vector.load %arg10[%c0_68, %c0_69] : memref<8x128xf32, #tpu.memory_space<vmem>>, vector<8x128xf32>
      tpu.vector_store %arg10[%c0_68, %c0_69], %156 {strides = array<i32>} : memref<8x128xf32, #tpu.memory_space<vmem>>, vector<8x128xf32>,
      %c0_70 = arith.constant 0 : index
      %c0_71 = arith.constant 0 : index
      %158 = vector.load %arg4[%c0_70, %c0_71] : memref<8x128xf32, #tpu.memory_space<vmem>>, vector<8x128xf32>
      %c0_72 = arith.constant 0 : index
      %c0_73 = arith.constant 0 : index
      %159 = vector.load %arg11[%c0_72, %c0_73] : memref<8x128xf32, #tpu.memory_space<vmem>>, vector<8x128xf32>
      tpu.vector_store %arg11[%c0_72, %c0_73], %158 {strides = array<i32>} : memref<8x128xf32, #tpu.memory_space<vmem>>, vector<8x128xf32>,
    } else {
    }
    %c0 = arith.constant 0 : index
    %c0_1 = arith.constant 0 : index
    %3 = vector.load %arg5[%c0, %c0_1] : memref<128x256xbf16, #tpu.memory_space<vmem>>, vector<128x256xbf16>
    %c0_2 = arith.constant 0 : index
    %c0_3 = arith.constant 0 : index
    %4 = vector.load %arg6[%c0_2, %c0_3] : memref<1x256xf32, #tpu.memory_space<vmem>>, vector<1x256xf32>
    %c0_4 = arith.constant 0 : index
    %c0_5 = arith.constant 0 : index
    %5 = vector.load %arg10[%c0_4, %c0_5] : memref<8x128xf32, #tpu.memory_space<vmem>>, vector<8x128xf32>
    %c0_6 = arith.constant 0 : index
    %c0_7 = arith.constant 0 : index
    %6 = vector.load %arg11[%c0_6, %c0_7] : memref<8x128xf32, #tpu.memory_space<vmem>>, vector<8x128xf32>
    %c0_i32_8 = arith.constant 0 : i32
    %7 = arith.truncf %6 : vector<8x128xf32> to vector<8x128xbf16>
    %cst = arith.constant dense<0.000000e+00> : vector<8x256xf32>
    %8 = tpu.matmul %7, %3, %cst {dimension_numbers = #tpu.dot_dimension_numbers<[1], [0], [0], [1], [0, 0, 1, 1], [], []>} : vector<8x128xbf16>, vector<128x256xbf16>, vector<8x256xf32> -> vector<8x256xf32>
    %9 = vector.broadcast %4 : vector<1x256xf32> to vector<8x256xf32>
    %10 = arith.addf %8, %9 : vector<8x256xf32>
    %11 = math.tanh %10 : vector<8x256xf32>
    %12 = arith.index_cast %c0_i32_8 : i32 to index
    %c0_9 = arith.constant 0 : index
    %c0_10 = arith.constant 0 : index
    %13 = vector.load %arg2[%12, %c0_9, %c0_10] : memref<4x8x128xf32, #tpu.memory_space<vmem>>, vector<1x8x128xf32>
    %14 = vector.shape_cast %13 : vector<1x8x128xf32> to vector<8x128xf32>
    %15 = vector.extract_strided_slice %11 {offsets = [0, 0], sizes = [8, 128], strides = [1, 1]} : vector<8x256xf32> to vector<8x128xf32>
    %cst_11 = arith.constant 1.000000e+00 : f32
    %16 = vector.broadcast %cst_11 : f32 to vector<8x128xf32>
    %17 = arith.addf %16, %15 : vector<8x128xf32>
    %cst_12 = arith.constant 5.000000e-01 : f32
    %18 = vector.broadcast %cst_12 : f32 to vector<8x128xf32>
    %19 = arith.mulf %18, %17 : vector<8x128xf32>
    %20 = vector.extract_strided_slice %11 {offsets = [0, 128], sizes = [8, 128], strides = [1, 1]} : vector<8x256xf32> to vector<8x128xf32>
    %cst_13 = arith.constant 1.000000e+00 : f32
    %21 = vector.broadcast %cst_13 : f32 to vector<8x128xf32>
    %22 = arith.addf %21, %20 : vector<8x128xf32>
    %cst_14 = arith.constant 5.000000e-01 : f32
    %23 = vector.broadcast %cst_14 : f32 to vector<8x128xf32>
    %24 = arith.mulf %23, %22 : vector<8x128xf32>
    %25 = arith.mulf %5, %24 : vector<8x128xf32>
    %26 = arith.mulf %14, %19 : vector<8x128xf32>
    %27 = arith.addf %25, %26 : vector<8x128xf32>
    %cst_15 = arith.constant 1.000000e+00 : f32
    %28 = vector.broadcast %cst_15 : f32 to vector<8x128xf32>
    %29 = arith.subf %27, %28 : vector<8x128xf32>
    %cst_16 = arith.constant 0.000000e+00 : f32
    %30 = vector.broadcast %cst_16 : f32 to vector<8x128xf32>
    %31 = arith.cmpf oge, %29, %30 : vector<8x128xf32>
    %32 = arith.extui %31 : vector<8x128xi1> to vector<8x128xi32>
    %33 = arith.sitofp %32 : vector<8x128xi32> to vector<8x128xf32>
    %cst_17 = arith.constant 1.000000e+00 : f32
    %34 = vector.broadcast %cst_17 : f32 to vector<8x128xf32>
    %35 = arith.mulf %33, %34 : vector<8x128xf32>
    %cst_18 = arith.constant 1.000000e+00 : f32
    %36 = vector.broadcast %cst_18 : f32 to vector<8x128xf32>
    %37 = arith.subf %36, %35 : vector<8x128xf32>
    %38 = arith.mulf %27, %37 : vector<8x128xf32>
    %39 = arith.index_cast %c0_i32_8 : i32 to index
    %c0_19 = arith.constant 0 : index
    %c0_20 = arith.constant 0 : index
    %40 = vector.load %arg7[%39, %c0_19, %c0_20] : memref<4x8x128xf32, #tpu.memory_space<vmem>>, vector<1x8x128xf32>
    %41 = vector.shape_cast %40 : vector<1x8x128xf32> to vector<8x128xf32>
    %42 = vector.shape_cast %35 : vector<8x128xf32> to vector<1x8x128xf32>
    tpu.vector_store %arg7[%39, %c0_19, %c0_20], %42 {strides = array<i32>} : memref<4x8x128xf32, #tpu.memory_space<vmem>>, vector<1x8x128xf32>,
    %c1_i32 = arith.constant 1 : i32
    %43 = arith.truncf %35 : vector<8x128xf32> to vector<8x128xbf16>
    %cst_21 = arith.constant dense<0.000000e+00> : vector<8x256xf32>
    %44 = tpu.matmul %43, %3, %cst_21 {dimension_numbers = #tpu.dot_dimension_numbers<[1], [0], [0], [1], [0, 0, 1, 1], [], []>} : vector<8x128xbf16>, vector<128x256xbf16>, vector<8x256xf32> -> vector<8x256xf32>
    %45 = vector.broadcast %4 : vector<1x256xf32> to vector<8x256xf32>
    %46 = arith.addf %44, %45 : vector<8x256xf32>
    %47 = math.tanh %46 : vector<8x256xf32>
    %48 = arith.index_cast %c1_i32 : i32 to index
    %c0_22 = arith.constant 0 : index
    %c0_23 = arith.constant 0 : index
    %49 = vector.load %arg2[%48, %c0_22, %c0_23] : memref<4x8x128xf32, #tpu.memory_space<vmem>>, vector<1x8x128xf32>
    %50 = vector.shape_cast %49 : vector<1x8x128xf32> to vector<8x128xf32>
    %51 = vector.extract_strided_slice %47 {offsets = [0, 0], sizes = [8, 128], strides = [1, 1]} : vector<8x256xf32> to vector<8x128xf32>
    %cst_24 = arith.constant 1.000000e+00 : f32
    %52 = vector.broadcast %cst_24 : f32 to vector<8x128xf32>
    %53 = arith.addf %52, %51 : vector<8x128xf32>
    %cst_25 = arith.constant 5.000000e-01 : f32
    %54 = vector.broadcast %cst_25 : f32 to vector<8x128xf32>
    %55 = arith.mulf %54, %53 : vector<8x128xf32>
    %56 = vector.extract_strided_slice %47 {offsets = [0, 128], sizes = [8, 128], strides = [1, 1]} : vector<8x256xf32> to vector<8x128xf32>
    %cst_26 = arith.constant 1.000000e+00 : f32
    %57 = vector.broadcast %cst_26 : f32 to vector<8x128xf32>
    %58 = arith.addf %57, %56 : vector<8x128xf32>
    %cst_27 = arith.constant 5.000000e-01 : f32
    %59 = vector.broadcast %cst_27 : f32 to vector<8x128xf32>
    %60 = arith.mulf %59, %58 : vector<8x128xf32>
    %61 = arith.mulf %38, %60 : vector<8x128xf32>
    %62 = arith.mulf %50, %55 : vector<8x128xf32>
    %63 = arith.addf %61, %62 : vector<8x128xf32>
    %cst_28 = arith.constant 1.000000e+00 : f32
    %64 = vector.broadcast %cst_28 : f32 to vector<8x128xf32>
    %65 = arith.subf %63, %64 : vector<8x128xf32>
    %cst_29 = arith.constant 0.000000e+00 : f32
    %66 = vector.broadcast %cst_29 : f32 to vector<8x128xf32>
    %67 = arith.cmpf oge, %65, %66 : vector<8x128xf32>
    %68 = arith.extui %67 : vector<8x128xi1> to vector<8x128xi32>
    %69 = arith.sitofp %68 : vector<8x128xi32> to vector<8x128xf32>
    %cst_30 = arith.constant 1.000000e+00 : f32
    %70 = vector.broadcast %cst_30 : f32 to vector<8x128xf32>
    %71 = arith.mulf %69, %70 : vector<8x128xf32>
    %cst_31 = arith.constant 1.000000e+00 : f32
    %72 = vector.broadcast %cst_31 : f32 to vector<8x128xf32>
    %73 = arith.subf %72, %71 : vector<8x128xf32>
    %74 = arith.mulf %63, %73 : vector<8x128xf32>
    %75 = arith.index_cast %c1_i32 : i32 to index
    %c0_32 = arith.constant 0 : index
    %c0_33 = arith.constant 0 : index
    %76 = vector.load %arg7[%75, %c0_32, %c0_33] : memref<4x8x128xf32, #tpu.memory_space<vmem>>, vector<1x8x128xf32>
    %77 = vector.shape_cast %76 : vector<1x8x128xf32> to vector<8x128xf32>
    %78 = vector.shape_cast %71 : vector<8x128xf32> to vector<1x8x128xf32>
    tpu.vector_store %arg7[%75, %c0_32, %c0_33], %78 {strides = array<i32>} : memref<4x8x128xf32, #tpu.memory_space<vmem>>, vector<1x8x128xf32>,
    %c2_i32 = arith.constant 2 : i32
    %79 = arith.truncf %71 : vector<8x128xf32> to vector<8x128xbf16>
    %cst_34 = arith.constant dense<0.000000e+00> : vector<8x256xf32>
    %80 = tpu.matmul %79, %3, %cst_34 {dimension_numbers = #tpu.dot_dimension_numbers<[1], [0], [0], [1], [0, 0, 1, 1], [], []>} : vector<8x128xbf16>, vector<128x256xbf16>, vector<8x256xf32> -> vector<8x256xf32>
    %81 = vector.broadcast %4 : vector<1x256xf32> to vector<8x256xf32>
    %82 = arith.addf %80, %81 : vector<8x256xf32>
    %83 = math.tanh %82 : vector<8x256xf32>
    %84 = arith.index_cast %c2_i32 : i32 to index
    %c0_35 = arith.constant 0 : index
    %c0_36 = arith.constant 0 : index
    %85 = vector.load %arg2[%84, %c0_35, %c0_36] : memref<4x8x128xf32, #tpu.memory_space<vmem>>, vector<1x8x128xf32>
    %86 = vector.shape_cast %85 : vector<1x8x128xf32> to vector<8x128xf32>
    %87 = vector.extract_strided_slice %83 {offsets = [0, 0], sizes = [8, 128], strides = [1, 1]} : vector<8x256xf32> to vector<8x128xf32>
    %cst_37 = arith.constant 1.000000e+00 : f32
    %88 = vector.broadcast %cst_37 : f32 to vector<8x128xf32>
    %89 = arith.addf %88, %87 : vector<8x128xf32>
    %cst_38 = arith.constant 5.000000e-01 : f32
    %90 = vector.broadcast %cst_38 : f32 to vector<8x128xf32>
    %91 = arith.mulf %90, %89 : vector<8x128xf32>
    %92 = vector.extract_strided_slice %83 {offsets = [0, 128], sizes = [8, 128], strides = [1, 1]} : vector<8x256xf32> to vector<8x128xf32>
    %cst_39 = arith.constant 1.000000e+00 : f32
    %93 = vector.broadcast %cst_39 : f32 to vector<8x128xf32>
    %94 = arith.addf %93, %92 : vector<8x128xf32>
    %cst_40 = arith.constant 5.000000e-01 : f32
    %95 = vector.broadcast %cst_40 : f32 to vector<8x128xf32>
    %96 = arith.mulf %95, %94 : vector<8x128xf32>
    %97 = arith.mulf %74, %96 : vector<8x128xf32>
    %98 = arith.mulf %86, %91 : vector<8x128xf32>
    %99 = arith.addf %97, %98 : vector<8x128xf32>
    %cst_41 = arith.constant 1.000000e+00 : f32
    %100 = vector.broadcast %cst_41 : f32 to vector<8x128xf32>
    %101 = arith.subf %99, %100 : vector<8x128xf32>
    %cst_42 = arith.constant 0.000000e+00 : f32
    %102 = vector.broadcast %cst_42 : f32 to vector<8x128xf32>
    %103 = arith.cmpf oge, %101, %102 : vector<8x128xf32>
    %104 = arith.extui %103 : vector<8x128xi1> to vector<8x128xi32>
    %105 = arith.sitofp %104 : vector<8x128xi32> to vector<8x128xf32>
    %cst_43 = arith.constant 1.000000e+00 : f32
    %106 = vector.broadcast %cst_43 : f32 to vector<8x128xf32>
    %107 = arith.mulf %105, %106 : vector<8x128xf32>
    %cst_44 = arith.constant 1.000000e+00 : f32
    %108 = vector.broadcast %cst_44 : f32 to vector<8x128xf32>
    %109 = arith.subf %108, %107 : vector<8x128xf32>
    %110 = arith.mulf %99, %109 : vector<8x128xf32>
    %111 = arith.index_cast %c2_i32 : i32 to index
    %c0_45 = arith.constant 0 : index
    %c0_46 = arith.constant 0 : index
    %112 = vector.load %arg7[%111, %c0_45, %c0_46] : memref<4x8x128xf32, #tpu.memory_space<vmem>>, vector<1x8x128xf32>
    %113 = vector.shape_cast %112 : vector<1x8x128xf32> to vector<8x128xf32>
    %114 = vector.shape_cast %107 : vector<8x128xf32> to vector<1x8x128xf32>
    tpu.vector_store %arg7[%111, %c0_45, %c0_46], %114 {strides = array<i32>} : memref<4x8x128xf32, #tpu.memory_space<vmem>>, vector<1x8x128xf32>,
    %c3_i32 = arith.constant 3 : i32
    %115 = arith.truncf %107 : vector<8x128xf32> to vector<8x128xbf16>
    %cst_47 = arith.constant dense<0.000000e+00> : vector<8x256xf32>
    %116 = tpu.matmul %115, %3, %cst_47 {dimension_numbers = #tpu.dot_dimension_numbers<[1], [0], [0], [1], [0, 0, 1, 1], [], []>} : vector<8x128xbf16>, vector<128x256xbf16>, vector<8x256xf32> -> vector<8x256xf32>
    %117 = vector.broadcast %4 : vector<1x256xf32> to vector<8x256xf32>
    %118 = arith.addf %116, %117 : vector<8x256xf32>
    %119 = math.tanh %118 : vector<8x256xf32>
    %120 = arith.index_cast %c3_i32 : i32 to index
    %c0_48 = arith.constant 0 : index
    %c0_49 = arith.constant 0 : index
    %121 = vector.load %arg2[%120, %c0_48, %c0_49] : memref<4x8x128xf32, #tpu.memory_space<vmem>>, vector<1x8x128xf32>
    %122 = vector.shape_cast %121 : vector<1x8x128xf32> to vector<8x128xf32>
    %123 = vector.extract_strided_slice %119 {offsets = [0, 0], sizes = [8, 128], strides = [1, 1]} : vector<8x256xf32> to vector<8x128xf32>
    %cst_50 = arith.constant 1.000000e+00 : f32
    %124 = vector.broadcast %cst_50 : f32 to vector<8x128xf32>
    %125 = arith.addf %124, %123 : vector<8x128xf32>
    %cst_51 = arith.constant 5.000000e-01 : f32
    %126 = vector.broadcast %cst_51 : f32 to vector<8x128xf32>
    %127 = arith.mulf %126, %125 : vector<8x128xf32>
    %128 = vector.extract_strided_slice %119 {offsets = [0, 128], sizes = [8, 128], strides = [1, 1]} : vector<8x256xf32> to vector<8x128xf32>
    %cst_52 = arith.constant 1.000000e+00 : f32
    %129 = vector.broadcast %cst_52 : f32 to vector<8x128xf32>
    %130 = arith.addf %129, %128 : vector<8x128xf32>
    %cst_53 = arith.constant 5.000000e-01 : f32
    %131 = vector.broadcast %cst_53 : f32 to vector<8x128xf32>
    %132 = arith.mulf %131, %130 : vector<8x128xf32>
    %133 = arith.mulf %110, %132 : vector<8x128xf32>
    %134 = arith.mulf %122, %127 : vector<8x128xf32>
    %135 = arith.addf %133, %134 : vector<8x128xf32>
    %cst_54 = arith.constant 1.000000e+00 : f32
    %136 = vector.broadcast %cst_54 : f32 to vector<8x128xf32>
    %137 = arith.subf %135, %136 : vector<8x128xf32>
    %cst_55 = arith.constant 0.000000e+00 : f32
    %138 = vector.broadcast %cst_55 : f32 to vector<8x128xf32>
    %139 = arith.cmpf oge, %137, %138 : vector<8x128xf32>
    %140 = arith.extui %139 : vector<8x128xi1> to vector<8x128xi32>
    %141 = arith.sitofp %140 : vector<8x128xi32> to vector<8x128xf32>
    %cst_56 = arith.constant 1.000000e+00 : f32
    %142 = vector.broadcast %cst_56 : f32 to vector<8x128xf32>
    %143 = arith.mulf %141, %142 : vector<8x128xf32>
    %cst_57 = arith.constant 1.000000e+00 : f32
    %144 = vector.broadcast %cst_57 : f32 to vector<8x128xf32>
    %145 = arith.subf %144, %143 : vector<8x128xf32>
    %146 = arith.mulf %135, %145 : vector<8x128xf32>
    %147 = arith.index_cast %c3_i32 : i32 to index
    %c0_58 = arith.constant 0 : index
    %c0_59 = arith.constant 0 : index
    %148 = vector.load %arg7[%147, %c0_58, %c0_59] : memref<4x8x128xf32, #tpu.memory_space<vmem>>, vector<1x8x128xf32>
    %149 = vector.shape_cast %148 : vector<1x8x128xf32> to vector<8x128xf32>
    %150 = vector.shape_cast %143 : vector<8x128xf32> to vector<1x8x128xf32>
    tpu.vector_store %arg7[%147, %c0_58, %c0_59], %150 {strides = array<i32>} : memref<4x8x128xf32, #tpu.memory_space<vmem>>, vector<1x8x128xf32>,
    %c4_i32 = arith.constant 4 : i32
    %c0_60 = arith.constant 0 : index
    %c0_61 = arith.constant 0 : index
    %151 = vector.load %arg10[%c0_60, %c0_61] : memref<8x128xf32, #tpu.memory_space<vmem>>, vector<8x128xf32>
    tpu.vector_store %arg10[%c0_60, %c0_61], %146 {strides = array<i32>} : memref<8x128xf32, #tpu.memory_space<vmem>>, vector<8x128xf32>,
    %c0_62 = arith.constant 0 : index
    %c0_63 = arith.constant 0 : index
    %152 = vector.load %arg11[%c0_62, %c0_63] : memref<8x128xf32, #tpu.memory_space<vmem>>, vector<8x128xf32>
    tpu.vector_store %arg11[%c0_62, %c0_63], %143 {strides = array<i32>} : memref<8x128xf32, #tpu.memory_space<vmem>>, vector<8x128xf32>,
    %c0_i32_64 = arith.constant 0 : i32
    %153 = arith.cmpi eq, %arg1, %c0_i32_64 : i32
    %154 = arith.extui %153 : i1 to i32
    %c0_i32_65 = arith.constant 0 : i32
    %155 = arith.cmpi ne, %154, %c0_i32_65 : i32
    scf.if %155 {
      %c0_66 = arith.constant 0 : index
      %c0_67 = arith.constant 0 : index
      %156 = vector.load %arg8[%c0_66, %c0_67] : memref<8x128xf32, #tpu.memory_space<vmem>>, vector<8x128xf32>
      tpu.vector_store %arg8[%c0_66, %c0_67], %146 {strides = array<i32>} : memref<8x128xf32, #tpu.memory_space<vmem>>, vector<8x128xf32>,
      %c0_68 = arith.constant 0 : index
      %c0_69 = arith.constant 0 : index
      %157 = vector.load %arg9[%c0_68, %c0_69] : memref<8x128xf32, #tpu.memory_space<vmem>>, vector<8x128xf32>
      tpu.vector_store %arg9[%c0_68, %c0_69], %143 {strides = array<i32>} : memref<8x128xf32, #tpu.memory_space<vmem>>, vector<8x128xf32>,
    } else {
    }
    return
  }
  func.func @transform_0(%arg0: i32, %arg1: i32) -> (i32, i32, i32) {
    %c0_i32 = arith.constant 0 : i32
    %c0_i32_0 = arith.constant 0 : i32
    return %arg1, %arg0, %c0_i32 : i32, i32, i32
  }
  func.func @transform_1(%arg0: i32, %arg1: i32) -> (i32, i32) {
    %c0_i32 = arith.constant 0 : i32
    %c0_i32_0 = arith.constant 0 : i32
    return %arg0, %c0_i32 : i32, i32
  }
  func.func @transform_2(%arg0: i32, %arg1: i32) -> (i32, i32) {
    %c0_i32 = arith.constant 0 : i32
    %c0_i32_0 = arith.constant 0 : i32
    return %arg0, %c0_i32 : i32, i32
  }
  func.func @transform_3(%arg0: i32, %arg1: i32) -> (i32, i32) {
    %c0_i32 = arith.constant 0 : i32
    %c0_i32_0 = arith.constant 0 : i32
    %c0_i32_1 = arith.constant 0 : i32
    return %c0_i32, %c0_i32_0 : i32, i32
  }
  func.func @transform_4(%arg0: i32, %arg1: i32) -> (i32, i32) {
    %c0_i32 = arith.constant 0 : i32
    %c0_i32_0 = arith.constant 0 : i32
    %c0_i32_1 = arith.constant 0 : i32
    return %c0_i32, %c0_i32_0 : i32, i32
  }
  func.func @transform_5(%arg0: i32, %arg1: i32) -> (i32, i32, i32) {
    %c0_i32 = arith.constant 0 : i32
    %c0_i32_0 = arith.constant 0 : i32
    return %arg1, %arg0, %c0_i32 : i32, i32, i32
  }
  func.func @transform_6(%arg0: i32, %arg1: i32) -> (i32, i32) {
    %c0_i32 = arith.constant 0 : i32
    %c0_i32_0 = arith.constant 0 : i32
    return %arg0, %c0_i32 : i32, i32
  }
  func.func @transform_7(%arg0: i32, %arg1: i32) -> (i32, i32) {
    %c0_i32 = arith.constant 0 : i32
    %c0_i32_0 = arith.constant 0 : i32
    return %arg0, %c0_i32 : i32, i32
  }
}

</mosaic_0001>

<bundles_post_ra>
// kernel: tpu_custom_call.1
= control target key start
LH: loop header
LB: loop body
LE: loop exit
PB: predicated region body
PF: predicated region fallthrough
CT: control target
= control target key end

     0   :  { %13 = vsyncpa [#allocation5], 0  ;;  %s890_s0 = inlined_call_operand.hbm [shape: f32[4,8,128], index: 0, kind: input, shape index: {}]   ;;  %s891_s1 = inlined_call_operand.hbm [shape: f32[8,128], index: 1, kind: input, shape index: {}]   ;;  %s892_s2 = inlined_call_operand.hbm [shape: f32[8,128], index: 2, kind: input, shape index: {}]   ;;  %s893_s3 = inlined_call_operand.hbm [shape: bf16[128,256], index: 3, kind: input, shape index: {}]   ;;  %s894_s4 = inlined_call_operand.vmem [shape: f32[1,256], index: 4, kind: input, shape index: {}]   ;;  %s895_s5 = inlined_call_operand.hbm [shape: f32[4,8,128], index: 5, kind: output, shape index: {0}]   ;;  %s896_s6 = inlined_call_operand.hbm [shape: f32[8,128], index: 6, kind: output, shape index: {1}]   ;;  %s897_s7 = inlined_call_operand.hbm [shape: f32[8,128], index: 7, kind: output, shape index: {2}]  }
   0x1   :  { %14 = vsyncpa [#allocation8], 0 }
   0x2   :  { %15 = vsyncpa [#allocation11], 0 }
   0x3   :  { %16 = vsyncpa [#allocation6], 0  ;;  %s36_s26 = sshll.u32 %s891_s1, 4  ;;  %s37_s26 = int_to_ptr.hbm [resolvable:$true] %s36_s26 }
   0x4   :  { %17 = vsyncpa [#allocation14], 0  ;;  %s742_s27 = smov [#allocation7]   ;;  %s22_s8 = sshll.u32 %s890_s0, 4  ;;  %s23_s8 = int_to_ptr.hbm [resolvable:$true] %s22_s8 }
   0x5   :  { %s38_s28 = sshll.u32 %s742_s27, 4  ;;  %s743_s9 = smov [#allocation4]   ;;  %s39_s28 = int_to_ptr.vmem [resolvable:$true] %s38_s28 }
   0x6   :  { %41 = dma.hbm_to_vmem [thread:$0]  %s37_s26, 128, %s39_s28, [#allocation8]  }
   0x7   :  { %s24_s10 = sshll.u32 %s743_s9, 4  ;;  %s744_s11 = smov 128   ;;  %s25_s10 = int_to_ptr.vmem [resolvable:$true] %s24_s10 }
   0x8   :  { %s745_s12 = smov 8   ;;  %s47_s14 = sshll.u32 %s892_s2, 4  ;;  %s48_s14 = int_to_ptr.hbm [resolvable:$true] %s47_s14 }
   0x9   :  { %30 = dma.hbm_to_vmem [thread:$0]  %s23_s8, 512, %s25_s10, [#allocation5], %s744_s11, %s744_s11, %s745_s12  }
   0xa   :  { %s746_s15 = smov [#allocation9]   ;;  %s57_s18 = sshll.u32 %s893_s3, 4  ;;  %s58_s18 = int_to_ptr.hbm [resolvable:$true] %s57_s18 }
   0xb   :  { %s49_s16 = sshll.u32 %s746_s15, 4  ;;  %s747_s19 = smov [#allocation10]   ;;  %s50_s16 = int_to_ptr.vmem [resolvable:$true] %s49_s16 }
   0xc   :  { %52 = dma.hbm_to_vmem [thread:$0]  %s48_s14, 128, %s50_s16, [#allocation8]  }
   0xd   :  { %s59_s20 = sshll.u32 %s747_s19, 4  ;;  %s60_s20 = int_to_ptr.vmem [resolvable:$true] %s59_s20 }
   0xe   :  { %65 = dma.hbm_to_vmem [thread:$0]  %s58_s18, 2048, %s60_s20, [#allocation11], %s744_s11, %s744_s11, %s745_s12  }
   0xf   :  { %732 = dma.done.wait [#allocation5], 512  }
  0x10   :  { %733 = vsyncadd [#allocation5], 4294966784 }
  0x11   :  { %734 = dma.done.wait [#allocation8], 256  }
  0x12   :  { %735 = vsyncadd [#allocation8], 4294967040 }
  0x13   :  { %736 = dma.done.wait [#allocation11], 2048  }
  0x14   :  { %737 = vsyncadd [#allocation11], 4294965248  ;;  %v495_v0 = vld [vmem:[#allocation10 + $0x70] sm:$0xf]  ;;  %v536_v1 = vld [vmem:[#allocation10 + $0x74] sm:$0xf0] }
  0x15   :  { %v535_v2 = vld [vmem:[#allocation10 + $0x74] sm:$0xf]  ;;  %v811_v3 = vor.u32 %v536_v1, %v495_v0  ;;  %v497_v4 = vld [vmem:[#allocation10 + $0x78] sm:$0xf0]  ;;  %v487_v5 = vld [vmem:[#allocation10 + $0x60] sm:$0xf] }
  0x16   :  { %v534_v6 = vld [vmem:[#allocation10 + $0x64] sm:$0xf0]  ;;  %v813_v7 = vor.u32 %v535_v2, %v497_v4  ;;  %v533_v8 = vld [vmem:[#allocation10 + $0x64] sm:$0xf]  ;;  %v489_v9 = vld [vmem:[#allocation10 + $0x68] sm:$0xf0] }
  0x17   :  { %197 = vmatpush.bf16.msra.mxu0 %v811_v3  ;;  %v816_v10 = vor.u32 %v534_v6, %v487_v5  ;;  %241 = vmatpush.bf16.msra.mxu2 %v811_v3  ;;  %v820_v11 = vor.u32 %v533_v8, %v489_v9  ;;  %v479_v12 = vld [vmem:[#allocation10 + $0x50] sm:$0xf]  ;;  %v532_v13 = vld [vmem:[#allocation10 + $0x54] sm:$0xf0]  ;;  %v531_v14 = vld [vmem:[#allocation10 + $0x54] sm:$0xf] }
  0x18   :  { %210 = vmatpush.bf16.msra.mxu1 %v813_v7  ;;  %254 = vmatpush.bf16.msra.mxu3 %v813_v7  ;;  %v481_v15 = vld [vmem:[#allocation10 + $0x58] sm:$0xf0]  ;;  %v824_v16 = vor.u32 %v532_v13, %v479_v12  ;;  %v471_v18 = vld [vmem:[#allocation10 + $0x40] sm:$0xf]  ;;  %v530_v19 = vld [vmem:[#allocation10 + $0x44] sm:$0xf0] }
  0x19   :  { %v828_v17 = vor.u32 %v531_v14, %v481_v15  ;;  %v529_v20 = vld [vmem:[#allocation10 + $0x44] sm:$0xf]  ;;  %v473_v21 = vld [vmem:[#allocation10 + $0x48] sm:$0xf0]  ;;  %v832_v22 = vor.u32 %v530_v19, %v471_v18  ;;  %v463_v24 = vld [vmem:[#allocation10 + $0x30] sm:$0xf] }
  0x1a   :  { %v836_v23 = vor.u32 %v529_v20, %v473_v21  ;;  %v528_v25 = vld [vmem:[#allocation10 + $0x34] sm:$0xf0]  ;;  %v527_v26 = vld [vmem:[#allocation10 + $0x34] sm:$0xf]  ;;  %v465_v27 = vld [vmem:[#allocation10 + $0x38] sm:$0xf0] }
  0x1b   :  { %198 = vmatpush.bf16.msra.mxu0 %v816_v10  ;;  %242 = vmatpush.bf16.msra.mxu2 %v816_v10  ;;  %v464_v28 = vor.u32 %v528_v25, %v463_v24  ;;  %v468_v29 = vor.u32 %v527_v26, %v465_v27  ;;  %v455_v30 = vld [vmem:[#allocation10 + $0x20] sm:$0xf]  ;;  %v526_v31 = vld [vmem:[#allocation10 + $0x24] sm:$0xf0]  ;;  %v525_v32 = vld [vmem:[#allocation10 + $0x24] sm:$0xf] }
  0x1c   :  { %211 = vmatpush.bf16.msra.mxu1 %v820_v11  ;;  %255 = vmatpush.bf16.msra.mxu3 %v820_v11  ;;  %v457_v33 = vld [vmem:[#allocation10 + $0x28] sm:$0xf0]  ;;  %v456_v34 = vor.u32 %v526_v31, %v455_v30  ;;  %v447_v36 = vld [vmem:[#allocation10 + $0x10] sm:$0xf]  ;;  %v524_v37 = vld [vmem:[#allocation10 + $0x14] sm:$0xf0] }
  0x1d   :  { %v460_v35 = vor.u32 %v525_v32, %v457_v33  ;;  %v523_v38 = vld [vmem:[#allocation10 + $0x14] sm:$0xf]  ;;  %v449_v39 = vld [vmem:[#allocation10 + $0x18] sm:$0xf0]  ;;  %v448_v40 = vor.u32 %v524_v37, %v447_v36  ;;  %v439_v42 = vld [vmem:[#allocation10] sm:$0xf] }
  0x1e   :  { %v452_v41 = vor.u32 %v523_v38, %v449_v39  ;;  %v522_v43 = vld [vmem:[#allocation10 + $0x4] sm:$0xf0]  ;;  %v521_v44 = vld [vmem:[#allocation10 + $0x4] sm:$0xf]  ;;  %v441_v45 = vld [vmem:[#allocation10 + $0x8] sm:$0xf0] }
  0x1f   :  { %199 = vmatpush.bf16.msra.mxu0 %v824_v16  ;;  %243 = vmatpush.bf16.msra.mxu2 %v824_v16  ;;  %v440_v46 = vor.u32 %v522_v43, %v439_v42  ;;  %v90_v47 = vld [vmem:[#allocation9] sm:$0xff]  ;;  %v444_v48 = vor.u32 %v521_v44, %v441_v45  ;;  %v108_v50 = vld [vmem:[%s894_s4] sm:$0x3]  ;;  %s750_s4 = smov [#allocation12]   ;;  %s391_s24 = sshll.u32 %s895_s5, 4  ;;  %s392_s24 = int_to_ptr.hbm [resolvable:$true] %s391_s24 }
  0x20   :  { %212 = vmatpush.bf16.msra.mxu1 %v828_v17  ;;  %256 = vmatpush.bf16.msra.mxu3 %v828_v17  ;;  %v111_v49 = vpack.c.bf16 %v90_v47, %v90_v47  ;;  %v862_v51 = vperm.slane %v108_v50, 0  ;;  %v864_v52 = vperm.slane %v108_v50, 1  ;;  %v225_v62 = vld [vmem:[#allocation4] sm:$0xff]  ;;  %v270_v21 = vld [vmem:[#allocation4 + $0x8] sm:$0xff]  ;;  %s389_s21 = sshll.u32 %s750_s4, 4  ;;  %s751_s25 = smov [#allocation13]   ;;  %s390_s21 = int_to_ptr.vmem [resolvable:$true] %s389_s21 }
  0x21   :  { %v88_v1 = vld [vmem:[#allocation7] sm:$0xff]  ;;  %s403_s26 = sshll.u32 %s751_s25, 4  ;;  %s405_s29 = sshll.u32 %s896_s6, 4  ;;  %s404_s26 = int_to_ptr.vmem [resolvable:$true] %s403_s26  ;;  %s406_s29 = int_to_ptr.hbm [resolvable:$true] %s405_s29 }
  0x22   :  { %s752_s30 = smov [#allocation15]   ;;  %s416_s5 = sshll.u32 %s897_s7, 4  ;;  %s417_s5 = int_to_ptr.hbm [resolvable:$true] %s416_s5 }
  0x23   :  { %200 = vmatpush.bf16.msra.mxu0 %v832_v22  ;;  %244 = vmatpush.bf16.msra.mxu2 %v832_v22  ;;  %s414_s8 = sshll.u32 %s752_s30, 4  ;;  %s415_s8 = int_to_ptr.vmem [resolvable:$true] %s414_s8 }
  0x24   :  { %213 = vmatpush.bf16.msra.mxu1 %v836_v23  ;;  %257 = vmatpush.bf16.msra.mxu3 %v836_v23 }
  0x27   :  { %201 = vmatpush.bf16.msra.mxu0 %v464_v28  ;;  %245 = vmatpush.bf16.msra.mxu2 %v464_v28 }
  0x28   :  { %214 = vmatpush.bf16.msra.mxu1 %v468_v29  ;;  %258 = vmatpush.bf16.msra.mxu3 %v468_v29 }
  0x2b   :  { %202 = vmatpush.bf16.msra.mxu0 %v456_v34  ;;  %246 = vmatpush.bf16.msra.mxu2 %v456_v34 }
  0x2c   :  { %215 = vmatpush.bf16.msra.mxu1 %v460_v35  ;;  %259 = vmatpush.bf16.msra.mxu3 %v460_v35 }
  0x2f   :  { %203 = vmatpush.bf16.msra.mxu0 %v448_v40  ;;  %247 = vmatpush.bf16.msra.mxu2 %v448_v40 }
  0x30   :  { %216 = vmatpush.bf16.msra.mxu1 %v452_v41  ;;  %260 = vmatpush.bf16.msra.mxu3 %v452_v41 }
  0x33   :  { %204 = vmatpush.bf16.msra.mxu0 %v440_v46  ;;  %248 = vmatpush.bf16.msra.mxu2 %v440_v46 }
  0x34   :  { %217 = vmatpush.bf16.msra.mxu1 %v444_v48  ;;  %261 = vmatpush.bf16.msra.mxu3 %v444_v48 }
  0x36   :  { %205 = vmatmul.bf16.vlgmr.msra.gmra.mxu0 %v111_v49 }
  0x37   :  { %287 = vmatpush.bf16.msrb.mxu0 %v811_v3  ;;  %333 = vmatpush.bf16.msrb.mxu2 %v811_v3 }
  0x38   :  { %300 = vmatpush.bf16.msrb.mxu1 %v813_v7  ;;  %346 = vmatpush.bf16.msrb.mxu3 %v813_v7  ;;  %v748_v7 = vmov 0.0  }
  0x39   :  { %218 = vmatmul.bf16.vlgmr.msra.gmra.mxu1 %v111_v49 }
  0x3b   :  { %288 = vmatpush.bf16.msrb.mxu0 %v816_v10  ;;  %334 = vmatpush.bf16.msrb.mxu2 %v816_v10  ;;  %v749_v10 = vmov 1.0|1.0  }
  0x3c   :  { %301 = vmatpush.bf16.msrb.mxu1 %v820_v11  ;;  %347 = vmatpush.bf16.msrb.mxu3 %v820_v11 }
  0x3f   :  { %289 = vmatpush.bf16.msrb.mxu0 %v824_v16  ;;  %335 = vmatpush.bf16.msrb.mxu2 %v824_v16 }
  0x40   :  { %302 = vmatpush.bf16.msrb.mxu1 %v828_v17  ;;  %348 = vmatpush.bf16.msrb.mxu3 %v828_v17 }
  0x43   :  { %290 = vmatpush.bf16.msrb.mxu0 %v832_v22  ;;  %336 = vmatpush.bf16.msrb.mxu2 %v832_v22 }
  0x44   :  { %303 = vmatpush.bf16.msrb.mxu1 %v836_v23  ;;  %349 = vmatpush.bf16.msrb.mxu3 %v836_v23 }
  0x47   :  { %291 = vmatpush.bf16.msrb.mxu0 %v464_v28  ;;  %337 = vmatpush.bf16.msrb.mxu2 %v464_v28 }
  0x48   :  { %304 = vmatpush.bf16.msrb.mxu1 %v468_v29  ;;  %350 = vmatpush.bf16.msrb.mxu3 %v468_v29 }
  0x4b   :  { %292 = vmatpush.bf16.msrb.mxu0 %v456_v34  ;;  %338 = vmatpush.bf16.msrb.mxu2 %v456_v34 }
  0x4c   :  { %305 = vmatpush.bf16.msrb.mxu1 %v460_v35  ;;  %351 = vmatpush.bf16.msrb.mxu3 %v460_v35 }
  0x4f   :  { %293 = vmatpush.bf16.msrb.mxu0 %v448_v40  ;;  %339 = vmatpush.bf16.msrb.mxu2 %v448_v40 }
  0x50   :  { %306 = vmatpush.bf16.msrb.mxu1 %v452_v41  ;;  %352 = vmatpush.bf16.msrb.mxu3 %v452_v41  ;;  %v316_v41 = vld [vmem:[#allocation4 + $0x10] sm:$0xff] }
  0x53   :  { %294 = vmatpush.bf16.msrb.mxu0 %v440_v46  ;;  %340 = vmatpush.bf16.msrb.mxu2 %v440_v46 }
  0x54   :  { %307 = vmatpush.bf16.msrb.mxu1 %v444_v48  ;;  %353 = vmatpush.bf16.msrb.mxu3 %v444_v48 }
  0xb3   :  { %v206_v53 = vpop.f32.mrf.mxu0 }
  0xb4   :  { %v207_v54 = vadd.f32 %v206_v53, %v862_v51 }
  0xb6   :  { %v219_v55 = vpop.f32.mrf.mxu1  ;;  %548 = vtanh.f32 %v207_v54 }
  0xb7   :  { %v220_v56 = vadd.f32 %v219_v55, %v864_v52 }
  0xb9   :  { %550 = vtanh.f32 %v220_v56 }
  0xbb   :  { %v208_v57 = vpop.f32.mrf.mxu0 }
  0xbc   :  { %v549_v58 = vpop.eup %548 }
  0xbd   :  { %v226_v61 = vadd.f32 1.0, %v549_v58 }
  0xbe   :  { %v221_v59 = vpop.f32.mrf.mxu1 }
  0xbf   :  { %v551_v60 = vpop.eup %550  ;;  %v227_v0 = vmul.f32 0.5, %v226_v61 }
  0xc0   :  { %v228_v63 = vadd.f32 1.0, %v551_v60 }
  0xc1   :  { %v231_v3 = vmul.f32 %v227_v0, %v225_v62 }
  0xc2   :  { %v229_v2 = vmul.f32 0.5, %v228_v63  ;;  %v362_v63 = vld [vmem:[#allocation4 + $0x18] sm:$0xff] }
  0xc4   :  { %v230_v4 = vmul.f32 %v229_v2, %v88_v1 }
  0xc6   :  { %v232_v5 = vadd.f32 %v231_v3, %v230_v4 }
  0xc8   :  { %v501_v6 = vadd.f32 -1.0, %v232_v5 }
  0xca   :  { %vm234_vm0 = vcmp.ge.f32.partialorder %v501_v6, 0.0 }
  0xcb   :  { %v502_v8 = vsel %vm234_vm0, 1.0, %v748_v7  ;;  %vm503_vm1 = vmpackc.low %vm234_vm0, %vm234_vm0 }
  0xcc   :  { %v237_v9 = vsub.f32 1.0, %v502_v8  ;;  %239 = vst [vmem:[#allocation12] sm:$0xff] %v502_v8  ;;  %504 = vmatmul.msk.bf16.vlgmr.msra.gmra.mxu2 %vm503_vm1, %v749_v10  ;;  %506 = vmatmul.msk.bf16.vlgmr.msra.gmra.mxu3 %vm503_vm1, %v749_v10 }
  0xce   :  { %v238_v11 = vmul.f32 %v237_v9, %v232_v5 }
 0x14f   :  { %v250_v12 = vpop.f32.mrf.mxu2  ;;  %v263_v13 = vpop.f32.mrf.mxu3 }
 0x150   :  { %v251_v14 = vadd.f32 %v250_v12, %v862_v51  ;;  %v264_v15 = vadd.f32 %v263_v13, %v864_v52 }
 0x152   :  { %552 = vtanh.f32 %v251_v14 }
 0x153   :  { %554 = vtanh.f32 %v264_v15 }
 0x157   :  { %v252_v16 = vpop.f32.mrf.mxu2  ;;  %v265_v17 = vpop.f32.mrf.mxu3 }
 0x158   :  { %v553_v18 = vpop.eup %552 }
 0x159   :  { %v555_v19 = vpop.eup %554  ;;  %v271_v20 = vadd.f32 1.0, %v553_v18 }
 0x15a   :  { %v273_v22 = vadd.f32 1.0, %v555_v19 }
 0x15b   :  { %v272_v23 = vmul.f32 0.5, %v271_v20 }
 0x15c   :  { %v274_v24 = vmul.f32 0.5, %v273_v22 }
 0x15d   :  { %v276_v25 = vmul.f32 %v272_v23, %v270_v21 }
 0x15e   :  { %v275_v26 = vmul.f32 %v274_v24, %v238_v11 }
 0x160   :  { %v277_v27 = vadd.f32 %v276_v25, %v275_v26 }
 0x162   :  { %v507_v28 = vadd.f32 -1.0, %v277_v27 }
 0x164   :  { %vm279_vm2 = vcmp.ge.f32.partialorder %v507_v28, 0.0 }
 0x165   :  { %v508_v29 = vsel %vm279_vm2, 1.0, %v748_v7  ;;  %vm509_vm3 = vmpackc.low %vm279_vm2, %vm279_vm2 }
 0x166   :  { %v282_v30 = vsub.f32 1.0, %v508_v29  ;;  %285 = vst [vmem:[#allocation12 + $0x8] sm:$0xff] %v508_v29  ;;  %510 = vmatmul.msk.bf16.vlgmr.msrb.gmra.mxu0 %vm509_vm3, %v749_v10  ;;  %512 = vmatmul.msk.bf16.vlgmr.msrb.gmra.mxu1 %vm509_vm3, %v749_v10 }
 0x168   :  { %v283_v31 = vmul.f32 %v282_v30, %v277_v27 }
 0x1e3   :  { %v296_v32 = vpop.f32.mrf.mxu0  ;;  %v309_v33 = vpop.f32.mrf.mxu1 }
 0x1e4   :  { %v297_v34 = vadd.f32 %v296_v32, %v862_v51  ;;  %v310_v35 = vadd.f32 %v309_v33, %v864_v52 }
 0x1e6   :  { %556 = vtanh.f32 %v297_v34 }
 0x1e7   :  { %558 = vtanh.f32 %v310_v35 }
 0x1eb   :  { %v298_v36 = vpop.f32.mrf.mxu0  ;;  %v311_v37 = vpop.f32.mrf.mxu1 }
 0x1ec   :  { %v557_v38 = vpop.eup %556 }
 0x1ed   :  { %v559_v39 = vpop.eup %558  ;;  %v317_v40 = vadd.f32 1.0, %v557_v38 }
 0x1ee   :  { %v319_v42 = vadd.f32 1.0, %v559_v39 }
 0x1ef   :  { %v318_v43 = vmul.f32 0.5, %v317_v40 }
 0x1f0   :  { %v320_v44 = vmul.f32 0.5, %v319_v42 }
 0x1f1   :  { %v322_v45 = vmul.f32 %v318_v43, %v316_v41 }
 0x1f2   :  { %v321_v46 = vmul.f32 %v320_v44, %v283_v31 }
 0x1f4   :  { %v323_v47 = vadd.f32 %v322_v45, %v321_v46 }
 0x1f6   :  { %v513_v48 = vadd.f32 -1.0, %v323_v47 }
 0x1f8   :  { %vm325_vm4 = vcmp.ge.f32.partialorder %v513_v48, 0.0 }
 0x1f9   :  { %v514_v49 = vsel %vm325_vm4, 1.0, %v748_v7  ;;  %vm515_vm5 = vmpackc.low %vm325_vm4, %vm325_vm4 }
 0x1fa   :  { %v328_v50 = vsub.f32 1.0, %v514_v49  ;;  %331 = vst [vmem:[#allocation12 + $0x10] sm:$0xff] %v514_v49  ;;  %516 = vmatmul.msk.bf16.vlgmr.msrb.gmra.mxu2 %vm515_vm5, %v749_v10  ;;  %518 = vmatmul.msk.bf16.vlgmr.msrb.gmra.mxu3 %vm515_vm5, %v749_v10 }
 0x1fc   :  { %v329_v53 = vmul.f32 %v328_v50, %v323_v47 }
 0x27d   :  { %v342_v54 = vpop.f32.mrf.mxu2  ;;  %v355_v55 = vpop.f32.mrf.mxu3 }
 0x27e   :  { %v343_v56 = vadd.f32 %v342_v54, %v862_v51  ;;  %v356_v57 = vadd.f32 %v355_v55, %v864_v52 }
 0x280   :  { %560 = vtanh.f32 %v343_v56 }
 0x281   :  { %562 = vtanh.f32 %v356_v57 }
 0x285   :  { %v344_v58 = vpop.f32.mrf.mxu2  ;;  %v357_v59 = vpop.f32.mrf.mxu3 }
 0x286   :  { %v561_v60 = vpop.eup %560 }
 0x287   :  { %v563_v61 = vpop.eup %562  ;;  %v363_v62 = vadd.f32 1.0, %v561_v60 }
 0x288   :  { %v365_v0 = vadd.f32 1.0, %v563_v61 }
 0x289   :  { %v364_v1 = vmul.f32 0.5, %v363_v62 }
 0x28a   :  { %v366_v2 = vmul.f32 0.5, %v365_v0 }
 0x28b   :  { %v368_v3 = vmul.f32 %v364_v1, %v362_v63 }
 0x28c   :  { %v367_v4 = vmul.f32 %v366_v2, %v329_v53 }
 0x28e   :  { %v369_v5 = vadd.f32 %v368_v3, %v367_v4 }
 0x290   :  { %v519_v51 = vadd.f32 -1.0, %v369_v5 }
 0x292   :  { %vm371_vm6 = vcmp.ge.f32.partialorder %v519_v51, 0.0 }
 0x293   :  { %v520_v52 = vsel %vm371_vm6, 1.0, %v748_v7 }
 0x294   :  { %v374_v6 = vsub.f32 1.0, %v520_v52  ;;  %377 = vst [vmem:[#allocation12 + $0x18] sm:$0xff] %v520_v52 }
 0x295   :  { %384 = vst [vmem:[#allocation15] sm:$0xff] %v520_v52  ;;  %397 = dma.vmem_to_hbm [thread:$0]  %s390_s21, 512, %s392_s24, [#allocation6], %s744_s11, %s744_s11, %s745_s12  }
 0x296   :  { %v375_v7 = vmul.f32 %v374_v6, %v369_v5 }
 0x298   :  { %383 = vst [vmem:[#allocation13] sm:$0xff] %v375_v7 }
 0x299   :  { %408 = dma.vmem_to_hbm [thread:$0]  %s404_s26, 128, %s406_s29, [#allocation14]  }
 0x29a   :  { %419 = dma.vmem_to_hbm [thread:$0]  %s415_s8, 128, %s417_s5, [#allocation14]  }
 0x29b   :  { %738 = dma.done.wait [#allocation6], 512  }
 0x29c   :  { %739 = vsyncadd [#allocation6], 4294966784 }
 0x29d   :  { %740 = dma.done.wait [#allocation14], 256  }
 0x29e   :  { %741 = vsyncadd [#allocation14], 4294967040 }
 0x29f   :  { %432 = vsyncpa [#allocation5], 1 }
 0x2a0   :  { %433 = vsyncpa [#allocation8], 1 }
 0x2a1   :  { %434 = vsyncpa [#allocation11], 1 }
 0x2a2   :  { %435 = vsyncpa [#allocation6], 1 }
 0x2a3   :  { %436 = vsyncpa [#allocation14], 1 }

</bundles_post_ra>
